<compile_context>
chip_gen: v7x
topology: tpu7x:2x2x1
jax: 0.10.0
libtpu: 0.0.40
codegen_flags: <defaults>
</compile_context>

<pallas_src>
import functools

import jax
import jax.numpy as jnp
from jax.experimental import pallas as pl
from jax.experimental.pallas import tpu as pltpu


def _conv_bn_relu_kernel(x_ref, w_ref, shift_ref, o_ref, *, KH, KW, Wp, L):
    """Fused stride-1 conv + folded-BN shift + ReLU for one image.

    x_ref:     (1, Cin_p, Lflat) bf16 -- padded image, spatial flattened with
               row stride Wp, plus a small zero tail so every tap slice is in
               bounds.
    w_ref:     (KH*KW, Cout, Cin_p) bf16 -- BN-scale-folded weights, one
               (Cout, Cin_p) matrix per tap.
    shift_ref: (Cout, 1) f32 -- folded BN shift.
    o_ref:     (1, Cout, L) f32 -- stride-1 conv output over the full padded
               width (valid columns selected in the wrapper).
    """
    cout = o_ref.shape[1]
    acc = jnp.zeros((cout, L), jnp.float32)
    for kh in range(KH):
        for kw in range(KW):
            start = kh * Wp + kw                       # static offset
            xs = x_ref[0, :, pl.ds(start, L)]          # (Cin_p, L) bf16
            wk = w_ref[kh * KW + kw]                   # (Cout, Cin_p) bf16
            acc = acc + jnp.dot(wk, xs, preferred_element_type=jnp.float32)
    y = acc + shift_ref[...]                           # BN shift (scale is in w)
    o_ref[0] = jnp.maximum(y, 0.0).astype(o_ref.dtype)


@functools.partial(jax.jit, static_argnames=("stride", "padding", "eps"))
def conv_bn_relu(x_nchw, w_oihw, gamma, beta, running_mean, running_var,
                 *, stride=1, padding=0, eps=1e-5):
    N, Cin, H, W = x_nchw.shape
    Cout, Cin_w, KH, KW = w_oihw.shape
    assert Cin == Cin_w

    OH = (H + 2 * padding - KH) // stride + 1
    OW = (W + 2 * padding - KW) // stride + 1
    Hp, Wp = H + 2 * padding, W + 2 * padding
    OH1, OW1 = Hp - KH + 1, Wp - KW + 1      # stride-1 conv output extents
    L = OH1 * Wp                             # flattened stride-1 output length

    # Pad Cin up to a multiple of 8 (sublane alignment), pad spatially for the
    # conv, and add one extra zero bottom row so the last tap's flat slice
    # (which reads up to KW-1 elements past row Hp-1) stays in bounds.
    Cin_p = -(-Cin // 8) * 8
    extra_rows = 1 if KW > 1 else 0
    xp = jnp.pad(x_nchw, ((0, 0), (0, Cin_p - Cin),
                          (padding, padding + extra_rows), (padding, padding)))
    Lflat = (Hp + extra_rows) * Wp
    xf = xp.reshape(N, Cin_p, Lflat).astype(jnp.bfloat16)

    # Fold eval-mode BN: scale into the weights, keep the shift separate.
    scale = gamma / jnp.sqrt(running_var + eps)                      # (Cout,)
    shift = (beta - running_mean * scale).reshape(Cout, 1).astype(jnp.float32)
    w_s = w_oihw.astype(jnp.float32) * scale[:, None, None, None]    # (Cout,Cin,KH,KW)
    w_s = jnp.pad(w_s, ((0, 0), (0, Cin_p - Cin), (0, 0), (0, 0)))
    w_r = jnp.transpose(w_s, (2, 3, 0, 1)).reshape(KH * KW, Cout, Cin_p)
    w_r = w_r.astype(jnp.bfloat16)

    kernel = functools.partial(_conv_bn_relu_kernel, KH=KH, KW=KW, Wp=Wp, L=L)

    out_flat = pl.pallas_call(
        kernel,
        out_shape=jax.ShapeDtypeStruct((N, Cout, L), jnp.float32),
        grid_spec=pltpu.PrefetchScalarGridSpec(
            num_scalar_prefetch=0,
            grid=(N,),
            in_specs=[
                pl.BlockSpec((1, Cin_p, Lflat), lambda n: (n, 0, 0)),
                pl.BlockSpec((KH * KW, Cout, Cin_p), lambda n: (0, 0, 0)),
                pl.BlockSpec((Cout, 1), lambda n: (0, 0)),
            ],
            out_specs=pl.BlockSpec((1, Cout, L), lambda n: (n, 0, 0)),
        ),
        compiler_params=pltpu.CompilerParams(
            dimension_semantics=("parallel",),
            vmem_limit_bytes=32 * 1024 * 1024),
    )(xf, w_r, shift)

    # Drop the invalid padded-width columns and apply the stride; the result
    # is already in NCHW order.
    out = out_flat.reshape(N, Cout, OH1, Wp)
    out = out[:, :, 0:(OH - 1) * stride + 1:stride,
              0:(OW - 1) * stride + 1:stride]
    return out


def _reference(x_nchw, w_oihw, gamma, beta, running_mean, running_var,
               *, stride, padding, eps=1e-5):
    conv = jax.lax.conv_general_dilated(
        x_nchw, w_oihw, window_strides=(stride, stride),
        padding=((padding, padding), (padding, padding)),
        dimension_numbers=("NCHW", "OIHW", "NCHW"))
    scale = gamma / jnp.sqrt(running_var + eps)
    shift = beta - running_mean * scale
    y = conv * scale[None, :, None, None] + shift[None, :, None, None]
    return jnp.maximum(y, 0.0)


if __name__ == "__main__":
    # Module config (synthetic): in_channels=4, out_channels=8, ks=3,
    # stride=1, padding=1.
    in_channels, out_channels, ks, stride, padding = 4, 8, 3, 1, 1
    N, H, W = 2, 16, 16

    key = jax.random.PRNGKey(0)
    kx, kw, kg, kb, km, kv = jax.random.split(key, 6)

    x = jax.random.normal(kx, (N, in_channels, H, W), dtype=jnp.float32)
    # Conv2d weight (Cout, Cin, KH, KW), bias=False
    fan_in = in_channels * ks * ks
    w = jax.random.normal(kw, (out_channels, in_channels, ks, ks),
                          dtype=jnp.float32) * (1.0 / jnp.sqrt(fan_in))
    # BatchNorm2d params + running stats (deterministic, non-trivial)
    gamma = 1.0 + 0.1 * jax.random.normal(kg, (out_channels,), dtype=jnp.float32)
    beta = 0.1 * jax.random.normal(kb, (out_channels,), dtype=jnp.float32)
    running_mean = 0.1 * jax.random.normal(km, (out_channels,), dtype=jnp.float32)
    running_var = 0.5 + jnp.abs(jax.random.normal(kv, (out_channels,),
                                                  dtype=jnp.float32))

    out = conv_bn_relu(x, w, gamma, beta, running_mean, running_var,
                       stride=stride, padding=padding)
    out = jax.block_until_ready(out)

    ref = _reference(x, w, gamma, beta, running_mean, running_var,
                     stride=stride, padding=padding)
    assert out.shape == (N, out_channels, H, W)
    # bf16 inputs to the MXU (f32 accumulation) -> relaxed tolerance vs f32 ref.
    assert jnp.allclose(out, ref, atol=5e-2, rtol=5e-2)

    print("KERNEL_OK")
</pallas_src>

<mosaic_0001>
module attributes {stable_mosaic.version = 11 : i64} {
  func.func @_conv_bn_relu_kernel(%arg0: i32, %arg1: memref<1x8x342xbf16, #tpu.memory_space<vmem>>, %arg2: memref<9x8x8xbf16, #tpu.memory_space<vmem>>, %arg3: memref<8x1xf32, #tpu.memory_space<vmem>>, %arg4: memref<1x8x288xf32, #tpu.memory_space<vmem>>) attributes {dimension_semantics = [#tpu.dimension_semantics<parallel>], iteration_bounds = array<i64: 2>, scalar_prefetch = 0 : i64, scratch_operands = 0 : i64, tpu.core_type = #tpu.core_type<tc>, window_params = [{transform_indices = @transform_0, window_bounds = array<i64: 1, 8, 342>}, {pipeline_mode = #tpu.pipeline_mode<synchronous>, transform_indices = @transform_1, window_bounds = array<i64: 9, 8, 8>}, {pipeline_mode = #tpu.pipeline_mode<synchronous>, transform_indices = @transform_2, window_bounds = array<i64: 8, 1>}, {transform_indices = @transform_3, window_bounds = array<i64: 1, 8, 288>}]} {
    %cst = arith.constant 0.000000e+00 : f32
    %0 = vector.broadcast %cst : f32 to vector<8x288xf32>
    %c0 = arith.constant 0 : index
    %c0_0 = arith.constant 0 : index
    %c0_1 = arith.constant 0 : index
    %1 = vector.load %arg1[%c0, %c0_0, %c0_1] : memref<1x8x342xbf16, #tpu.memory_space<vmem>>, vector<1x8x288xbf16>
    %2 = vector.shape_cast %1 : vector<1x8x288xbf16> to vector<8x288xbf16>
    %c0_2 = arith.constant 0 : index
    %c0_3 = arith.constant 0 : index
    %c0_4 = arith.constant 0 : index
    %3 = vector.load %arg2[%c0_2, %c0_3, %c0_4] : memref<9x8x8xbf16, #tpu.memory_space<vmem>>, vector<1x8x8xbf16>
    %4 = vector.shape_cast %3 : vector<1x8x8xbf16> to vector<8x8xbf16>
    %cst_5 = arith.constant dense<0.000000e+00> : vector<8x288xf32>
    %5 = tpu.matmul %4, %2, %cst_5 {dimension_numbers = #tpu.dot_dimension_numbers<[1], [0], [0], [1], [0, 0, 1, 1], [], []>} : vector<8x8xbf16>, vector<8x288xbf16>, vector<8x288xf32> -> vector<8x288xf32>
    %6 = arith.addf %0, %5 : vector<8x288xf32>
    %c0_6 = arith.constant 0 : index
    %c0_7 = arith.constant 0 : index
    %c1 = arith.constant 1 : index
    %7 = vector.load %arg1[%c0_6, %c0_7, %c1] : memref<1x8x342xbf16, #tpu.memory_space<vmem>>, vector<1x8x288xbf16>
    %8 = vector.shape_cast %7 : vector<1x8x288xbf16> to vector<8x288xbf16>
    %c1_8 = arith.constant 1 : index
    %c0_9 = arith.constant 0 : index
    %c0_10 = arith.constant 0 : index
    %9 = vector.load %arg2[%c1_8, %c0_9, %c0_10] : memref<9x8x8xbf16, #tpu.memory_space<vmem>>, vector<1x8x8xbf16>
    %10 = vector.shape_cast %9 : vector<1x8x8xbf16> to vector<8x8xbf16>
    %cst_11 = arith.constant dense<0.000000e+00> : vector<8x288xf32>
    %11 = tpu.matmul %10, %8, %cst_11 {dimension_numbers = #tpu.dot_dimension_numbers<[1], [0], [0], [1], [0, 0, 1, 1], [], []>} : vector<8x8xbf16>, vector<8x288xbf16>, vector<8x288xf32> -> vector<8x288xf32>
    %12 = arith.addf %6, %11 : vector<8x288xf32>
    %c0_12 = arith.constant 0 : index
    %c0_13 = arith.constant 0 : index
    %c2 = arith.constant 2 : index
    %13 = vector.load %arg1[%c0_12, %c0_13, %c2] : memref<1x8x342xbf16, #tpu.memory_space<vmem>>, vector<1x8x288xbf16>
    %14 = vector.shape_cast %13 : vector<1x8x288xbf16> to vector<8x288xbf16>
    %c2_14 = arith.constant 2 : index
    %c0_15 = arith.constant 0 : index
    %c0_16 = arith.constant 0 : index
    %15 = vector.load %arg2[%c2_14, %c0_15, %c0_16] : memref<9x8x8xbf16, #tpu.memory_space<vmem>>, vector<1x8x8xbf16>
    %16 = vector.shape_cast %15 : vector<1x8x8xbf16> to vector<8x8xbf16>
    %cst_17 = arith.constant dense<0.000000e+00> : vector<8x288xf32>
    %17 = tpu.matmul %16, %14, %cst_17 {dimension_numbers = #tpu.dot_dimension_numbers<[1], [0], [0], [1], [0, 0, 1, 1], [], []>} : vector<8x8xbf16>, vector<8x288xbf16>, vector<8x288xf32> -> vector<8x288xf32>
    %18 = arith.addf %12, %17 : vector<8x288xf32>
    %c0_18 = arith.constant 0 : index
    %c0_19 = arith.constant 0 : index
    %c18 = arith.constant 18 : index
    %19 = vector.load %arg1[%c0_18, %c0_19, %c18] : memref<1x8x342xbf16, #tpu.memory_space<vmem>>, vector<1x8x288xbf16>
    %20 = vector.shape_cast %19 : vector<1x8x288xbf16> to vector<8x288xbf16>
    %c3 = arith.constant 3 : index
    %c0_20 = arith.constant 0 : index
    %c0_21 = arith.constant 0 : index
    %21 = vector.load %arg2[%c3, %c0_20, %c0_21] : memref<9x8x8xbf16, #tpu.memory_space<vmem>>, vector<1x8x8xbf16>
    %22 = vector.shape_cast %21 : vector<1x8x8xbf16> to vector<8x8xbf16>
    %cst_22 = arith.constant dense<0.000000e+00> : vector<8x288xf32>
    %23 = tpu.matmul %22, %20, %cst_22 {dimension_numbers = #tpu.dot_dimension_numbers<[1], [0], [0], [1], [0, 0, 1, 1], [], []>} : vector<8x8xbf16>, vector<8x288xbf16>, vector<8x288xf32> -> vector<8x288xf32>
    %24 = arith.addf %18, %23 : vector<8x288xf32>
    %c0_23 = arith.constant 0 : index
    %c0_24 = arith.constant 0 : index
    %c19 = arith.constant 19 : index
    %25 = vector.load %arg1[%c0_23, %c0_24, %c19] : memref<1x8x342xbf16, #tpu.memory_space<vmem>>, vector<1x8x288xbf16>
    %26 = vector.shape_cast %25 : vector<1x8x288xbf16> to vector<8x288xbf16>
    %c4 = arith.constant 4 : index
    %c0_25 = arith.constant 0 : index
    %c0_26 = arith.constant 0 : index
    %27 = vector.load %arg2[%c4, %c0_25, %c0_26] : memref<9x8x8xbf16, #tpu.memory_space<vmem>>, vector<1x8x8xbf16>
    %28 = vector.shape_cast %27 : vector<1x8x8xbf16> to vector<8x8xbf16>
    %cst_27 = arith.constant dense<0.000000e+00> : vector<8x288xf32>
    %29 = tpu.matmul %28, %26, %cst_27 {dimension_numbers = #tpu.dot_dimension_numbers<[1], [0], [0], [1], [0, 0, 1, 1], [], []>} : vector<8x8xbf16>, vector<8x288xbf16>, vector<8x288xf32> -> vector<8x288xf32>
    %30 = arith.addf %24, %29 : vector<8x288xf32>
    %c0_28 = arith.constant 0 : index
    %c0_29 = arith.constant 0 : index
    %c20 = arith.constant 20 : index
    %31 = vector.load %arg1[%c0_28, %c0_29, %c20] : memref<1x8x342xbf16, #tpu.memory_space<vmem>>, vector<1x8x288xbf16>
    %32 = vector.shape_cast %31 : vector<1x8x288xbf16> to vector<8x288xbf16>
    %c5 = arith.constant 5 : index
    %c0_30 = arith.constant 0 : index
    %c0_31 = arith.constant 0 : index
    %33 = vector.load %arg2[%c5, %c0_30, %c0_31] : memref<9x8x8xbf16, #tpu.memory_space<vmem>>, vector<1x8x8xbf16>
    %34 = vector.shape_cast %33 : vector<1x8x8xbf16> to vector<8x8xbf16>
    %cst_32 = arith.constant dense<0.000000e+00> : vector<8x288xf32>
    %35 = tpu.matmul %34, %32, %cst_32 {dimension_numbers = #tpu.dot_dimension_numbers<[1], [0], [0], [1], [0, 0, 1, 1], [], []>} : vector<8x8xbf16>, vector<8x288xbf16>, vector<8x288xf32> -> vector<8x288xf32>
    %36 = arith.addf %30, %35 : vector<8x288xf32>
    %c0_33 = arith.constant 0 : index
    %c0_34 = arith.constant 0 : index
    %c36 = arith.constant 36 : index
    %37 = vector.load %arg1[%c0_33, %c0_34, %c36] : memref<1x8x342xbf16, #tpu.memory_space<vmem>>, vector<1x8x288xbf16>
    %38 = vector.shape_cast %37 : vector<1x8x288xbf16> to vector<8x288xbf16>
    %c6 = arith.constant 6 : index
    %c0_35 = arith.constant 0 : index
    %c0_36 = arith.constant 0 : index
    %39 = vector.load %arg2[%c6, %c0_35, %c0_36] : memref<9x8x8xbf16, #tpu.memory_space<vmem>>, vector<1x8x8xbf16>
    %40 = vector.shape_cast %39 : vector<1x8x8xbf16> to vector<8x8xbf16>
    %cst_37 = arith.constant dense<0.000000e+00> : vector<8x288xf32>
    %41 = tpu.matmul %40, %38, %cst_37 {dimension_numbers = #tpu.dot_dimension_numbers<[1], [0], [0], [1], [0, 0, 1, 1], [], []>} : vector<8x8xbf16>, vector<8x288xbf16>, vector<8x288xf32> -> vector<8x288xf32>
    %42 = arith.addf %36, %41 : vector<8x288xf32>
    %c0_38 = arith.constant 0 : index
    %c0_39 = arith.constant 0 : index
    %c37 = arith.constant 37 : index
    %43 = vector.load %arg1[%c0_38, %c0_39, %c37] : memref<1x8x342xbf16, #tpu.memory_space<vmem>>, vector<1x8x288xbf16>
    %44 = vector.shape_cast %43 : vector<1x8x288xbf16> to vector<8x288xbf16>
    %c7 = arith.constant 7 : index
    %c0_40 = arith.constant 0 : index
    %c0_41 = arith.constant 0 : index
    %45 = vector.load %arg2[%c7, %c0_40, %c0_41] : memref<9x8x8xbf16, #tpu.memory_space<vmem>>, vector<1x8x8xbf16>
    %46 = vector.shape_cast %45 : vector<1x8x8xbf16> to vector<8x8xbf16>
    %cst_42 = arith.constant dense<0.000000e+00> : vector<8x288xf32>
    %47 = tpu.matmul %46, %44, %cst_42 {dimension_numbers = #tpu.dot_dimension_numbers<[1], [0], [0], [1], [0, 0, 1, 1], [], []>} : vector<8x8xbf16>, vector<8x288xbf16>, vector<8x288xf32> -> vector<8x288xf32>
    %48 = arith.addf %42, %47 : vector<8x288xf32>
    %c0_43 = arith.constant 0 : index
    %c0_44 = arith.constant 0 : index
    %c38 = arith.constant 38 : index
    %49 = vector.load %arg1[%c0_43, %c0_44, %c38] : memref<1x8x342xbf16, #tpu.memory_space<vmem>>, vector<1x8x288xbf16>
    %50 = vector.shape_cast %49 : vector<1x8x288xbf16> to vector<8x288xbf16>
    %c8 = arith.constant 8 : index
    %c0_45 = arith.constant 0 : index
    %c0_46 = arith.constant 0 : index
    %51 = vector.load %arg2[%c8, %c0_45, %c0_46] : memref<9x8x8xbf16, #tpu.memory_space<vmem>>, vector<1x8x8xbf16>
    %52 = vector.shape_cast %51 : vector<1x8x8xbf16> to vector<8x8xbf16>
    %cst_47 = arith.constant dense<0.000000e+00> : vector<8x288xf32>
    %53 = tpu.matmul %52, %50, %cst_47 {dimension_numbers = #tpu.dot_dimension_numbers<[1], [0], [0], [1], [0, 0, 1, 1], [], []>} : vector<8x8xbf16>, vector<8x288xbf16>, vector<8x288xf32> -> vector<8x288xf32>
    %54 = arith.addf %48, %53 : vector<8x288xf32>
    %c0_48 = arith.constant 0 : index
    %c0_49 = arith.constant 0 : index
    %55 = vector.load %arg3[%c0_48, %c0_49] : memref<8x1xf32, #tpu.memory_space<vmem>>, vector<8x1xf32>
    %56 = vector.broadcast %55 : vector<8x1xf32> to vector<8x288xf32>
    %57 = arith.addf %54, %56 : vector<8x288xf32>
    %cst_50 = arith.constant 0.000000e+00 : f32
    %58 = vector.broadcast %cst_50 : f32 to vector<8x288xf32>
    %59 = arith.maximumf %57, %58 : vector<8x288xf32>
    %c0_51 = arith.constant 0 : index
    %c0_52 = arith.constant 0 : index
    %c0_53 = arith.constant 0 : index
    %60 = vector.load %arg4[%c0_51, %c0_52, %c0_53] : memref<1x8x288xf32, #tpu.memory_space<vmem>>, vector<1x8x288xf32>
    %61 = vector.shape_cast %60 : vector<1x8x288xf32> to vector<8x288xf32>
    %62 = vector.shape_cast %59 : vector<8x288xf32> to vector<1x8x288xf32>
    tpu.vector_store %arg4[%c0_51, %c0_52, %c0_53], %62 {strides = array<i32>} : memref<1x8x288xf32, #tpu.memory_space<vmem>>, vector<1x8x288xf32>,
    return
  }
  func.func @transform_0(%arg0: i32) -> (i32, i32, i32) {
    %c0_i32 = arith.constant 0 : i32
    %c0_i32_0 = arith.constant 0 : i32
    %c0_i32_1 = arith.constant 0 : i32
    return %arg0, %c0_i32, %c0_i32_0 : i32, i32, i32
  }
  func.func @transform_1(%arg0: i32) -> (i32, i32, i32) {
    %c0_i32 = arith.constant 0 : i32
    %c0_i32_0 = arith.constant 0 : i32
    %c0_i32_1 = arith.constant 0 : i32
    %c0_i32_2 = arith.constant 0 : i32
    return %c0_i32, %c0_i32_0, %c0_i32_1 : i32, i32, i32
  }
  func.func @transform_2(%arg0: i32) -> (i32, i32) {
    %c0_i32 = arith.constant 0 : i32
    %c0_i32_0 = arith.constant 0 : i32
    %c0_i32_1 = arith.constant 0 : i32
    return %c0_i32, %c0_i32_0 : i32, i32
  }
  func.func @transform_3(%arg0: i32) -> (i32, i32, i32) {
    %c0_i32 = arith.constant 0 : i32
    %c0_i32_0 = arith.constant 0 : i32
    %c0_i32_1 = arith.constant 0 : i32
    return %arg0, %c0_i32, %c0_i32_0 : i32, i32, i32
  }
}

</mosaic_0001>

<bundles_post_ra>
// kernel: conv_bn_relu.1
= control target key start
LH: loop header
LB: loop body
LE: loop exit
PB: predicated region body
PF: predicated region fallthrough
CT: control target
= control target key end

     0   :  { %s1385_s12 = smov 0   ;;  %s1520_s0 = inlined_call_operand.vmem [shape: bf16[2,8,342], index: 0, kind: input, shape index: {}]   ;;  %s1521_s1 = inlined_call_operand.vmem [shape: bf16[9,8,8], index: 1, kind: input, shape index: {}]   ;;  %s1522_s2 = inlined_call_operand.vmem [shape: f32[8,1], index: 2, kind: input, shape index: {}]   ;;  %s1523_s3 = inlined_call_operand.vmem [shape: f32[2,8,288], index: 3, kind: output, shape index: {}]  }
   0x1 LB: > { %s1202_s13 = sadd.s32 4294967295, %s1352_s12   ;;  %p1206_p0 = scmp.ge.s32.totalorder %s1352_s12, 1  ;;  %s1352_s12 = sphi %s1385_s12, %s13_s12  }
   0x2   : > { %p137_p1 = scmp.lt.s32.totalorder %s1352_s12, 3 }
   0x4   : > { %p138_p2 = pnand %p1206_p0, %p137_p1 }
   0x5   : > { %p161_p3 = scmp.lt.s32.totalorder (!%p138_p2), %s1202_s13, 1  ;;  %v1354_v0 = vmov (!%p138_p2), 0.0   ;;  %vm1355_vm0 = vmmov (!%p138_p2), 0   ;;  %v1356_v1 = vmov (!%p138_p2), 0   ;;  %s1357_s18 = smov (!%p138_p2), 127   ;;  %v1131_v6 = vld [vmem:[%s1522_s2] sm:$0xff] (!%p138_p2) }
   0x6   : > { %141 = sbr.rel (%p138_p2) target bundleno = 428 (0x1ac), region = 32  ;;  %1267 = vmatprep.subr.bf16.mxu1 (!%p138_p2), %v1354_v0  ;;  %1269 = vmatprep.mubr.msk.bf16.mxu1 (!%p138_p2), %vm1355_vm0, %v1354_v0  ;;  %s1358_s19 = smov (!%p138_p2), 126   ;;  %vm198_vm1 = vcmask (!%p138_p2), 1043456   ;;  %v1209_v10 = vld [vmem:[%s1521_s1 + $0x4] sm:$0xf] (!%p138_p2)  ;;  %vm194_vm2 = vcmask (!%p138_p2), 64512  }
   0x7   : > { %240 = vmatprep.mubr.bf16.mxu0 (!%p138_p2), %v1356_v1  ;;  %1342 = vset.pattern.permute.xlu0 (!%p138_p2), %v1356_v1  ;;  %s1359_s20 = smov (!%p138_p2), 110   ;;  %s1360_s21 = smov (!%p138_p2), 109   ;;  %vm191_vm3 = vcmask (!%p138_p2), 1039360   ;;  %vm390_vm4 = vcmask (!%p138_p2), 1031168   ;;  %v174_v20 = vld [vmem:[%s1521_s1] sm:$0xf] (!%p138_p2) }
   0x8   : > { %s1361_s22 = smov (!%p138_p2), 108   ;;  %s1362_s23 = smov (!%p138_p2), 92   ;;  %vm497_vm5 = vcmask (!%p138_p2), 900096   ;;  %v1219_v29 = vld [vmem:[%s1521_s1 + $0x8] sm:$0xf] (!%p138_p2)  ;;  %vm604_vm6 = vcmask (!%p138_p2), 891904  }
   0x9   : > { %s1363_s24 = smov (!%p138_p2), 91   ;;  %s1364_s25 = smov (!%p138_p2), 90   ;;  %v1223_v37 = vld [vmem:[%s1521_s1 + $0xc] sm:$0xf] (!%p138_p2)  ;;  %vm711_vm7 = vcmask (!%p138_p2), 883712   ;;  %vm818_vm8 = vcmask (!%p138_p2), 752640  }
   0xa   : > { %v1227_v45 = vld [vmem:[%s1521_s1 + $0x10] sm:$0xf] (!%p138_p2)  ;;  %v1231_v53 = vld [vmem:[%s1521_s1 + $0x14] sm:$0xf] (!%p138_p2)  ;;  %vm925_vm9 = vcmask (!%p138_p2), 744448   ;;  %vm1032_vm10 = vcmask (!%p138_p2), 736256  }
   0xb   : > { %v1235_v61 = vld [vmem:[%s1521_s1 + $0x18] sm:$0xf] (!%p138_p2)  ;;  %vm1145_vm11 = vcmask (!%p138_p2), 261120  }
   0xd   : > { %s1525_s13 = smov (!%p161_p3, %s1202_s13), 1 }
   0xe   : > { %s1321_s14 = smul.u32 12, %s1525_s13 }
  0x10   : > { %s165_s17 = scalar_lea.vmem %s1520_s0, %s1321_s14 }
  0x11   : > { %v1343_v2 = vld [vmem:[%s165_s17 + $0x8] ss:$0 sps:$4 sm:$0xff]   ;;  %v172_v3 = vld [vmem:[%s165_s17] sm:$0xff] }
  0x12   : > { %v1210_v4 = vcombine.low %v172_v3, %v172_v3  ;;  %189 = vrot.lane.b32.xlu1 %v1343_v2, %s1357_s18  ;;  %v1211_v5 = vcombine.high %v172_v3, %v172_v3  ;;  %v299_v11 = vsel %vm198_vm1, %v1343_v2, 0 }
  0x14   : > { %185 = vrot.lane.b32.xlu0 %v1210_v4, %s1357_s18  ;;  %v293_v18 = vsel %vm198_vm1, %v1210_v4, 0 }
  0x16   : > { %384 = vrot.lane.b32.xlu1 %v1210_v4, %s1358_s19 }
  0x18   : > { %187 = vrot.lane.b32.xlu0 %v1211_v5, %s1357_s18 }
  0x1a   : > { %388 = vrot.lane.b32.xlu1 %v1343_v2, %s1358_s19 }
  0x1c   : > { %386 = vrot.lane.b32.xlu0 %v1211_v5, %s1358_s19 }
  0x1e   : > { %493 = vrot.lane.b32.xlu1 %v1211_v5, %s1359_s20 }
  0x20   : > { %491 = vrot.lane.b32.xlu0 %v1210_v4, %s1359_s20 }
  0x22   : > { %598 = vrot.lane.b32.xlu1 %v1210_v4, %s1360_s21 }
  0x24   : > { %495 = vrot.lane.b32.xlu0 %v1343_v2, %s1359_s20 }
  0x26   : > { %602 = vrot.lane.b32.xlu1 %v1343_v2, %s1360_s21 }
  0x28   : > { %600 = vrot.lane.b32.xlu0 %v1211_v5, %s1360_s21  ;;  %s1322_s21 = smul.u32 24, %s1525_s13 }
  0x2a   : > { %707 = vrot.lane.b32.xlu1 %v1211_v5, %s1361_s22 }
  0x2c   : > { %705 = vrot.lane.b32.xlu0 %v1210_v4, %s1361_s22 }
  0x2e   : > { %812 = vrot.lane.b32.xlu1 %v1210_v4, %s1362_s23 }
  0x30   : > { %709 = vrot.lane.b32.xlu0 %v1343_v2, %s1361_s22 }
  0x32   : > { %816 = vrot.lane.b32.xlu1 %v1343_v2, %s1362_s23 }
  0x34   : > { %814 = vrot.lane.b32.xlu0 %v1211_v5, %s1362_s23 }
  0x36   : > { %921 = vrot.lane.b32.xlu1 %v1211_v5, %s1363_s24 }
  0x38   : > { %919 = vrot.lane.b32.xlu0 %v1210_v4, %s1363_s24 }
  0x3a   : > { %1026 = vrot.lane.b32.xlu1 %v1210_v4, %s1364_s25 }
  0x3c   : > { %923 = vrot.lane.b32.xlu0 %v1343_v2, %s1363_s24  ;;  %s170_s24 = scalar_lea.vmem %s1523_s3, %s1322_s21 }
  0x3e   : > { %1030 = vrot.lane.b32.xlu1 %v1343_v2, %s1364_s25 }
  0x40   : > { %1028 = vrot.lane.b32.xlu0 %v1211_v5, %s1364_s25 }
  0x44   : > { %1134 = vperm.xlu0 %1342, %v1131_v6   ;;  %v1239_v6 = vld [vmem:[%s1521_s1 + $0x1c] sm:$0xf] }
  0x84   : > { %v190_v7 = vpop.permute.xlu1 %189 }
  0x85   : > { %v206_v9 = vsel %vm198_vm1, %v190_v7, 0 }
  0x86   : > { %v186_v8 = vpop.permute.xlu0 %185  ;;  %1268 = vmatpush3.bf16.msra.mxu1 %v206_v9 }
  0x87   : > { %1273 = vmatprep.subr.bf16.mxu1 %v1354_v0 }
  0x88   : > { %v385_v12 = vpop.permute.xlu1 %384 }
  0x89   : > { %1270 = vmatmul.mubr.msk.bf16.vlgmr.msra.gmra.mrb[0].mxu1 %vm194_vm2, %v1209_v10 }
  0x8a   : > { %v188_v13 = vpop.permute.xlu0 %187  ;;  %1274 = vmatpush3.bf16.msra.mxu1 %v299_v11  ;;  %1275 = vmatprep.mubr.msk.bf16.mxu1 %vm1355_vm0, %v1354_v0  ;;  %v1243_v11 = vld [vmem:[%s1521_s1 + $0x20] sm:$0xf] }
  0x8b   : > { %v193_v14 = vsel %vm191_vm3, %v188_v13, %v190_v7  ;;  %v192_v15 = vsel %vm191_vm3, %v186_v8, %v188_v13  ;;  %1279 = vmatprep.subr.bf16.mxu1 %v1354_v0 }
  0x8c   : > { %1213 = vmatprep.subr.msk.bf16.mxu0 %vm198_vm1, %v193_v14  ;;  %v200_v16 = vsel %vm198_vm1, %v192_v15, 0  ;;  %v389_v17 = vpop.permute.xlu1 %388 }
  0x8d   : > { %209 = vmatpush1.bf16.msra.mxu0 %v200_v16  ;;  %v403_v22 = vsel %vm198_vm1, %v389_v17, 0 }
  0x8e   : > { %1216 = vmatprep.subr.msk.bf16.mxu0 %vm198_vm1, %v1211_v5  ;;  %v387_v19 = vpop.permute.xlu0 %386 }
  0x8f   : > { %v392_v21 = vsel %vm390_vm4, %v387_v19, %v389_v17  ;;  %v391_v25 = vsel %vm390_vm4, %v385_v12, %v387_v19 }
  0x90   : > { %1214 = vmatmul.mubr.msk.bf16.vlgmr.msra.gmra.mrb[0].mxu0 %vm194_vm2, %v1209_v10  ;;  %v494_v23 = vpop.permute.xlu1 %493  ;;  %v397_v26 = vsel %vm198_vm1, %v391_v25, 0 }
  0x91   : > { %302 = vmatpush1.bf16.msra.mxu0 %v293_v18  ;;  %333 = vmatprep.mubr.bf16.mxu0 %v1356_v1 }
  0x92   : > { %1276 = vmatmul.mubr.msk.bf16.vlgmr.msra.gmra.mrb[4].mxu1 %vm194_vm2, %v174_v20  ;;  %1220 = vmatprep.subr.msk.bf16.mxu0 %vm198_vm1, %v392_v21  ;;  %v492_v24 = vpop.permute.xlu0 %491 }
  0x93   : > { %1280 = vmatpush3.bf16.msra.mxu1 %v403_v22  ;;  %1281 = vmatprep.mubr.msk.bf16.mxu1 %vm1355_vm0, %v1354_v0  ;;  %v498_v33 = vsel %vm497_vm5, %v492_v24, %v494_v23 }
  0x94   : > { %1285 = vmatprep.subr.bf16.mxu1 %v1354_v0  ;;  %v599_v28 = vpop.permute.xlu1 %598  ;;  %v504_v35 = vsel %vm198_vm1, %v498_v33, 0 }
  0x96   : > { %v496_v27 = vpop.permute.xlu0 %495 }
  0x97   : > { %v499_v30 = vsel %vm497_vm5, %v494_v23, %v496_v27  ;;  %v510_v31 = vsel %vm198_vm1, %v496_v27, 0 }
  0x98   : > { %1217 = vmatmul.mubr.msk.bf16.vlgmr.msra.gmra.mrb[4].mxu0 %vm194_vm2, %v174_v20  ;;  %v603_v34 = vpop.permute.xlu1 %602 }
  0x99   : > { %406 = vmatpush1.bf16.msra.mxu0 %v397_v26  ;;  %437 = vmatprep.mubr.bf16.mxu0 %v1356_v1  ;;  %v617_v39 = vsel %vm198_vm1, %v603_v34, 0 }
  0x9a   : > { %1282 = vmatmul.mubr.msk.bf16.vlgmr.msra.gmra.mrb[8].mxu1 %vm194_vm2, %v1219_v29  ;;  %1224 = vmatprep.subr.msk.bf16.mxu0 %vm198_vm1, %v499_v30  ;;  %v601_v32 = vpop.permute.xlu0 %600 }
  0x9b   : > { %1286 = vmatpush3.bf16.msra.mxu1 %v510_v31  ;;  %1287 = vmatprep.mubr.msk.bf16.mxu1 %vm1355_vm0, %v1354_v0  ;;  %v606_v38 = vsel %vm604_vm6, %v601_v32, %v603_v34  ;;  %v605_v41 = vsel %vm604_vm6, %v599_v28, %v601_v32 }
  0x9c   : > { %1291 = vmatprep.subr.bf16.mxu1 %v1354_v0  ;;  %v708_v40 = vpop.permute.xlu1 %707  ;;  %v611_v43 = vsel %vm198_vm1, %v605_v41, 0 }
  0x9e   : > { %v706_v36 = vpop.permute.xlu0 %705 }
  0x9f   : > { %v712_v49 = vsel %vm711_vm7, %v706_v36, %v708_v40 }
  0xa0   : > { %1221 = vmatmul.mubr.msk.bf16.vlgmr.msra.gmra.mrb[8].mxu0 %vm194_vm2, %v1219_v29  ;;  %v813_v44 = vpop.permute.xlu1 %812  ;;  %v718_v51 = vsel %vm198_vm1, %v712_v49, 0 }
  0xa1   : > { %513 = vmatpush1.bf16.msra.mxu0 %v504_v35  ;;  %544 = vmatprep.mubr.bf16.mxu0 %v1356_v1 }
  0xa2   : > { %1288 = vmatmul.mubr.msk.bf16.vlgmr.msra.gmra.mrb[12].mxu1 %vm194_vm2, %v1223_v37  ;;  %1228 = vmatprep.subr.msk.bf16.mxu0 %vm198_vm1, %v606_v38  ;;  %v710_v42 = vpop.permute.xlu0 %709 }
  0xa3   : > { %1292 = vmatpush3.bf16.msra.mxu1 %v617_v39  ;;  %1293 = vmatprep.mubr.msk.bf16.mxu1 %vm1355_vm0, %v1354_v0  ;;  %v713_v46 = vsel %vm711_vm7, %v708_v40, %v710_v42  ;;  %v724_v47 = vsel %vm198_vm1, %v710_v42, 0 }
  0xa4   : > { %1297 = vmatprep.subr.bf16.mxu1 %v1354_v0  ;;  %v817_v50 = vpop.permute.xlu1 %816 }
  0xa5   : > { %v831_v55 = vsel %vm198_vm1, %v817_v50, 0 }
  0xa6   : > { %v815_v48 = vpop.permute.xlu0 %814 }
  0xa7   : > { %v820_v54 = vsel %vm818_vm8, %v815_v48, %v817_v50  ;;  %v819_v57 = vsel %vm818_vm8, %v813_v44, %v815_v48 }
  0xa8   : > { %1225 = vmatmul.mubr.msk.bf16.vlgmr.msra.gmra.mrb[12].mxu0 %vm194_vm2, %v1223_v37  ;;  %v922_v56 = vpop.permute.xlu1 %921  ;;  %v825_v59 = vsel %vm198_vm1, %v819_v57, 0 }
  0xa9   : > { %620 = vmatpush1.bf16.msra.mxu0 %v611_v43  ;;  %651 = vmatprep.mubr.bf16.mxu0 %v1356_v1 }
  0xaa   : > { %1294 = vmatmul.mubr.msk.bf16.vlgmr.msra.gmra.mrb[16].mxu1 %vm194_vm2, %v1227_v45  ;;  %1232 = vmatprep.subr.msk.bf16.mxu0 %vm198_vm1, %v713_v46  ;;  %v920_v52 = vpop.permute.xlu0 %919 }
  0xab   : > { %1298 = vmatpush3.bf16.msra.mxu1 %v724_v47  ;;  %1299 = vmatprep.mubr.msk.bf16.mxu1 %vm1355_vm0, %v1354_v0  ;;  %v926_v2 = vsel %vm925_vm9, %v920_v52, %v922_v56 }
  0xac   : > { %1303 = vmatprep.subr.bf16.mxu1 %v1354_v0  ;;  %v1027_v60 = vpop.permute.xlu1 %1026  ;;  %v932_v5 = vsel %vm198_vm1, %v926_v2, 0 }
  0xae   : > { %v924_v58 = vpop.permute.xlu0 %923 }
  0xaf   : > { %v927_v62 = vsel %vm925_vm9, %v922_v56, %v924_v58  ;;  %v938_v63 = vsel %vm198_vm1, %v924_v58, 0 }
  0xb0   : > { %1229 = vmatmul.mubr.msk.bf16.vlgmr.msra.gmra.mrb[16].mxu0 %vm194_vm2, %v1227_v45  ;;  %v1031_v4 = vpop.permute.xlu1 %1030 }
  0xb1   : > { %727 = vmatpush1.bf16.msra.mxu0 %v718_v51  ;;  %758 = vmatprep.mubr.bf16.mxu0 %v1356_v1  ;;  %v1045_v8 = vsel %vm198_vm1, %v1031_v4, 0 }
  0xb2   : > { %1300 = vmatmul.mubr.msk.bf16.vlgmr.msra.gmra.mrb[20].mxu1 %vm194_vm2, %v1231_v53  ;;  %1236 = vmatprep.subr.msk.bf16.mxu0 %vm198_vm1, %v820_v54  ;;  %v1029_v3 = vpop.permute.xlu0 %1028 }
  0xb3   : > { %1304 = vmatpush3.bf16.msra.mxu1 %v831_v55  ;;  %1305 = vmatprep.mubr.msk.bf16.mxu1 %vm1355_vm0, %v1354_v0  ;;  %v1034_v7 = vsel %vm1032_vm10, %v1029_v3, %v1031_v4  ;;  %v1033_v9 = vsel %vm1032_vm10, %v1027_v60, %v1029_v3 }
  0xb4   : > { %1309 = vmatprep.subr.bf16.mxu1 %v1354_v0  ;;  %v1039_v10 = vsel %vm198_vm1, %v1033_v9, 0 }
  0xb8   : > { %1233 = vmatmul.mubr.msk.bf16.vlgmr.msra.gmra.mrb[20].mxu0 %vm194_vm2, %v1231_v53 }
  0xb9   : > { %834 = vmatpush1.bf16.msra.mxu0 %v825_v59  ;;  %865 = vmatprep.mubr.bf16.mxu0 %v1356_v1 }
  0xba   : > { %1306 = vmatmul.mubr.msk.bf16.vlgmr.msra.gmra.mrb[24].mxu1 %vm194_vm2, %v1235_v61  ;;  %1240 = vmatprep.subr.msk.bf16.mxu0 %vm198_vm1, %v927_v62 }
  0xbb   : > { %1310 = vmatpush3.bf16.msra.mxu1 %v938_v63  ;;  %1311 = vmatprep.mubr.msk.bf16.mxu1 %vm1355_vm0, %v1354_v0 }
  0xbc   : > { %1315 = vmatprep.subr.bf16.mxu1 %v1354_v0 }
  0xc0   : > { %1237 = vmatmul.mubr.msk.bf16.vlgmr.msra.gmra.mrb[24].mxu0 %vm194_vm2, %v1235_v61 }
  0xc1   : > { %941 = vmatpush1.bf16.msra.mxu0 %v932_v5  ;;  %972 = vmatprep.mubr.bf16.mxu0 %v1356_v1 }
  0xc2   : > { %1312 = vmatmul.mubr.msk.bf16.vlgmr.msra.gmra.mrb[28].mxu1 %vm194_vm2, %v1239_v6  ;;  %1244 = vmatprep.subr.msk.bf16.mxu0 %vm198_vm1, %v1034_v7 }
  0xc3   : > { %1316 = vmatpush3.bf16.msra.mxu1 %v1045_v8  ;;  %1317 = vmatprep.mubr.msk.bf16.mxu1 %vm1355_vm0, %v1354_v0 }
  0xc8   : > { %1241 = vmatmul.mubr.msk.bf16.vlgmr.msra.gmra.mrb[28].mxu0 %vm194_vm2, %v1239_v6 }
  0xc9   : > { %1048 = vmatpush1.bf16.msra.mxu0 %v1039_v10  ;;  %1079 = vmatprep.mubr.bf16.mxu0 %v1356_v1 }
  0xca   : > { %1318 = vmatmul.mubr.msk.bf16.vlgmr.msra.gmra.mrb[32].mxu1 %vm194_vm2, %v1243_v11 }
  0xd0   : > { %1245 = vmatmul.mubr.msk.bf16.vlgmr.msra.gmra.mrb[32].mxu0 %vm194_vm2, %v1243_v11 }
 0x15c   : > { %v283_v12 = vpop.f32.mrb[0].mxu1 }
 0x15d   : > { %v1271_v13 = vpop.f32.mrb[1].mxu1 }
 0x15e   : > { %v286_v14 = vpop.f32.mrb[2].mxu1 }
 0x15f   : > { %v1272_v15 = vpop.f32.mrb[3].mxu1 }
 0x163   : > { %v242_v0 = vpop.f32.mrb[0].mxu0 }
 0x164   : > { %v244_v16 = vpop.f32.mrb[1].mxu0 }
 0x165   : > { %v246_v17 = vpop.f32.mrb[2].mxu0  ;;  %v376_v18 = vpop.f32.mrb[4].mxu1 }
 0x166   : > { %v247_v19 = vpop.f32.mrb[3].mxu0  ;;  %v377_v20 = vadd.f32 %v376_v18, %v283_v12  ;;  %v1277_v21 = vpop.f32.mrb[5].mxu1 }
 0x167   : > { %v379_v22 = vpop.f32.mrb[6].mxu1 }
 0x168   : > { %v1278_v23 = vpop.f32.mrb[7].mxu1 }
 0x16b   : > { %v335_v24 = vpop.f32.mrb[4].mxu0 }
 0x16c   : > { %v336_v25 = vadd.f32 %v335_v24, %v242_v0  ;;  %v337_v1 = vpop.f32.mrb[5].mxu0 }
 0x16d   : > { %v338_v26 = vadd.f32 %v337_v1, %v244_v16  ;;  %v339_v27 = vpop.f32.mrb[6].mxu0  ;;  %v480_v28 = vpop.f32.mrb[8].mxu1 }
 0x16e   : > { %v340_v29 = vpop.f32.mrb[7].mxu0  ;;  %v488_v30 = vadd.f32 %v480_v28, %v377_v20  ;;  %v1283_v31 = vpop.f32.mrb[9].mxu1 }
 0x16f   : > { %v483_v32 = vpop.f32.mrb[10].mxu1  ;;  %v1135_v28 = vpop.permute.xlu0 %1134 }
 0x170   : > { %v1284_v33 = vpop.f32.mrb[11].mxu1 }
 0x173   : > { %v439_v34 = vpop.f32.mrb[8].mxu0 }
 0x174   : > { %v486_v35 = vadd.f32 %v439_v34, %v336_v25  ;;  %v441_v36 = vpop.f32.mrb[9].mxu0 }
 0x175   : > { %v487_v37 = vadd.f32 %v441_v36, %v338_v26  ;;  %v443_v38 = vpop.f32.mrb[10].mxu0  ;;  %v587_v39 = vpop.f32.mrb[12].mxu1 }
 0x176   : > { %v444_v40 = vpop.f32.mrb[11].mxu0  ;;  %v595_v41 = vadd.f32 %v587_v39, %v488_v30  ;;  %v1289_v42 = vpop.f32.mrb[13].mxu1 }
 0x177   : > { %v590_v43 = vpop.f32.mrb[14].mxu1 }
 0x178   : > { %v1290_v44 = vpop.f32.mrb[15].mxu1 }
 0x17b   : > { %v546_v45 = vpop.f32.mrb[12].mxu0 }
 0x17c   : > { %v593_v46 = vadd.f32 %v546_v45, %v486_v35  ;;  %v548_v47 = vpop.f32.mrb[13].mxu0 }
 0x17d   : > { %v594_v48 = vadd.f32 %v548_v47, %v487_v37  ;;  %v550_v49 = vpop.f32.mrb[14].mxu0  ;;  %v694_v50 = vpop.f32.mrb[16].mxu1 }
 0x17e   : > { %v551_v51 = vpop.f32.mrb[15].mxu0  ;;  %v702_v52 = vadd.f32 %v694_v50, %v595_v41  ;;  %v1295_v53 = vpop.f32.mrb[17].mxu1 }
 0x17f   : > { %v697_v54 = vpop.f32.mrb[18].mxu1 }
 0x180   : > { %v1296_v55 = vpop.f32.mrb[19].mxu1 }
 0x183   : > { %v653_v56 = vpop.f32.mrb[16].mxu0 }
 0x184   : > { %v700_v57 = vadd.f32 %v653_v56, %v593_v46  ;;  %v655_v58 = vpop.f32.mrb[17].mxu0 }
 0x185   : > { %v701_v59 = vadd.f32 %v655_v58, %v594_v48  ;;  %v657_v60 = vpop.f32.mrb[18].mxu0  ;;  %v801_v61 = vpop.f32.mrb[20].mxu1 }
 0x186   : > { %v658_v62 = vpop.f32.mrb[19].mxu0  ;;  %v809_v63 = vadd.f32 %v801_v61, %v702_v52  ;;  %v1301_v2 = vpop.f32.mrb[21].mxu1 }
 0x187   : > { %v804_v3 = vpop.f32.mrb[22].mxu1 }
 0x188   : > { %v1302_v4 = vpop.f32.mrb[23].mxu1 }
 0x18b   : > { %v760_v5 = vpop.f32.mrb[20].mxu0 }
 0x18c   : > { %v807_v6 = vadd.f32 %v760_v5, %v700_v57  ;;  %v762_v7 = vpop.f32.mrb[21].mxu0 }
 0x18d   : > { %v808_v8 = vadd.f32 %v762_v7, %v701_v59  ;;  %v764_v9 = vpop.f32.mrb[22].mxu0  ;;  %v908_v10 = vpop.f32.mrb[24].mxu1 }
 0x18e   : > { %v765_v11 = vpop.f32.mrb[23].mxu0  ;;  %v916_v12 = vadd.f32 %v908_v10, %v809_v63  ;;  %v1307_v13 = vpop.f32.mrb[25].mxu1 }
 0x18f   : > { %v911_v14 = vpop.f32.mrb[26].mxu1 }
 0x190   : > { %v1308_v15 = vpop.f32.mrb[27].mxu1 }
 0x193   : > { %v867_v0 = vpop.f32.mrb[24].mxu0 }
 0x194   : > { %v914_v16 = vadd.f32 %v867_v0, %v807_v6  ;;  %v869_v17 = vpop.f32.mrb[25].mxu0 }
 0x195   : > { %v915_v18 = vadd.f32 %v869_v17, %v808_v8  ;;  %v871_v19 = vpop.f32.mrb[26].mxu0  ;;  %v1015_v20 = vpop.f32.mrb[28].mxu1 }
 0x196   : > { %v872_v21 = vpop.f32.mrb[27].mxu0  ;;  %v1023_v22 = vadd.f32 %v1015_v20, %v916_v12  ;;  %v1313_v23 = vpop.f32.mrb[29].mxu1 }
 0x197   : > { %v1018_v24 = vpop.f32.mrb[30].mxu1 }
 0x198   : > { %v1314_v25 = vpop.f32.mrb[31].mxu1 }
 0x19b   : > { %v974_v1 = vpop.f32.mrb[28].mxu0 }
 0x19c   : > { %v1021_v26 = vadd.f32 %v974_v1, %v914_v16  ;;  %v976_v27 = vpop.f32.mrb[29].mxu0 }
 0x19d   : > { %v1022_v29 = vadd.f32 %v976_v27, %v915_v18  ;;  %v978_v30 = vpop.f32.mrb[30].mxu0  ;;  %v1122_v31 = vpop.f32.mrb[32].mxu1 }
 0x19e   : > { %v979_v32 = vpop.f32.mrb[31].mxu0  ;;  %v1130_v33 = vadd.f32 %v1122_v31, %v1023_v22  ;;  %v1319_v34 = vpop.f32.mrb[33].mxu1 }
 0x19f   : > { %v1125_v35 = vpop.f32.mrb[34].mxu1 }
 0x1a0   : > { %v1139_v36 = vadd.f32 %v1135_v28, %v1130_v33  ;;  %v1320_v37 = vpop.f32.mrb[35].mxu1 }
 0x1a2   : > { %v1142_v38 = vmax.f32 %v1139_v36, 0.0 }
 0x1a3   : > { %v1081_v39 = vpop.f32.mrb[32].mxu0 }
 0x1a4   : > { %1146 = vst.msk [vmem:[%s170_s24 + $0x10] sm:$0xff] %vm1145_vm11, %v1142_v38  ;;  %v1128_v40 = vadd.f32 %v1081_v39, %v1021_v26  ;;  %v1083_v41 = vpop.f32.mrb[33].mxu0 }
 0x1a5   : > { %v1129_v42 = vadd.f32 %v1083_v41, %v1022_v29  ;;  %v1085_v43 = vpop.f32.mrb[34].mxu0 }
 0x1a6   : > { %v1137_v44 = vadd.f32 %v1135_v28, %v1128_v40  ;;  %v1086_v45 = vpop.f32.mrb[35].mxu0 }
 0x1a7   : > { %v1138_v46 = vadd.f32 %v1135_v28, %v1129_v42 }
 0x1a8   : > { %v1140_v47 = vmax.f32 %v1137_v44, 0.0 }
 0x1a9   : > { %v1141_v48 = vmax.f32 %v1138_v46, 0.0 }
 0x1aa   : > { %1143 = vst [vmem:[%s170_s24] sm:$0xff] %v1140_v47 }
 0x1ab   : > { %1144 = vst [vmem:[%s170_s24 + $0x8] sm:$0xff] %v1141_v48 }
 0x1ac PF: > { %s13_s12 = sadd.s32 1, %s1352_s12  }
 0x1ad   : > { %p10_p4 = scmp.ge.s32.totalorder %s13_s12, 4  }
 0x1af   :  { %12 = sbr.rel (!%p10_p4) target bundleno = 1 (0x1), region = 70 }

</bundles_post_ra>
